<compile_context>
chip_gen: v7x
topology: tpu7x:2x2x1
jax: 0.10.0
libtpu: 0.0.40
codegen_flags: <defaults>
</compile_context>

<pallas_src>
import math
import functools

import jax
import jax.numpy as jnp
from jax.experimental import pallas as pl
from jax.experimental.pallas import tpu as pltpu


def _pe_kernel(c_ref, o_ref, pe_ref, *, pos_per_block):
    """One seq-block of positional encoding, replicated over the batch block.

    c_ref : (3, row_tile, T) constants: [0]=pos offset within block,
            [1]=frequency (div_term expanded), [2]=phase (0 / pi/2)
    o_ref : (batch_tile, row_tile, T) output block
    pe_ref: (row_tile, T) f32 scratch; persists across the inner batch axis.
    """
    s = pl.program_id(0)

    # Compute the sin slab only on the first batch step of this seq block.
    @pl.when(pl.program_id(1) == 0)
    def _():
        pos0 = (s * pos_per_block).astype(jnp.float32)
        angle = (pos0 + c_ref[0]) * c_ref[1] + c_ref[2]   # single rounding of pos*freq
        pe_ref[...] = jnp.sin(angle)                       # one EUP op per unique element

    # Identical for every batch row: broadcast the cached slab into the store.
    o_ref[...] = jnp.broadcast_to(pe_ref[...][None], o_ref.shape).astype(o_ref.dtype)


def _divisors(n):
    return [d for d in range(1, n + 1) if n % d == 0]


def _choose_layout(B, S, d_model, slab_cap_elems=128 * 1024, out_cap_elems=2 * 1024 * 1024):
    """Pick (c, row_tile, batch_tile).

    Output is viewed as (B, G, T), G = S // c, T = c * d_model; one output
    block is (batch_tile, row_tile, T).  Legality: row_tile % 8 == 0 or
    row_tile == G (T is always the full last dim).  Preference: lane-dense T,
    sublane-dense row_tile, then as many positions per block as fit the slab
    cap (amortizes per-grid-step overhead).
    """
    candidates = []
    for c in _divisors(S):
        T = c * d_model
        G = S // c
        for row_tile in _divisors(G):
            if not (row_tile % 8 == 0 or row_tile == G):
                continue                      # illegal block shape
            P = row_tile * c                  # positions covered per block
            fits = (P * d_model <= slab_cap_elems)
            lane_dense = (T % 128 == 0)
            sub_dense = (row_tile % 8 == 0)
            candidates.append((fits, lane_dense, sub_dense, P, min(row_tile, 8), c, row_tile))

    fitting = [cd for cd in candidates if cd[0]]
    if fitting:
        best = max(fitting, key=lambda cd: cd[:5])
    else:  # pathological shapes: take the smallest legal slab
        best = min(candidates, key=lambda cd: cd[3])
    c, row_tile = best[5], best[6]
    P = row_tile * c

    b_fit = [bb for bb in _divisors(B) if bb * P * d_model <= out_cap_elems]
    batch_tile = max(b_fit) if b_fit else 1
    return c, row_tile, batch_tile


def baseline_positional_encoding(x, d_model):
    """Returns pe[:S, :] repeated over the batch dim, shape (B, S, d_model), float32."""
    B, S = int(x.shape[0]), int(x.shape[1])
    assert d_model % 2 == 0, "d_model must be even (same requirement as the PyTorch module)"

    c, row_tile, batch_tile = _choose_layout(B, S, d_model)
    T = c * d_model           # lane width of one chunk row
    G = S // c                # chunks per batch element
    P = row_tile * c          # positions covered per seq block

    # ---- host-side constant patterns (computed once, one DMA) -----------------
    div_term = jnp.exp(
        jnp.arange(0, d_model, 2, dtype=jnp.float32)
        * jnp.float32(-math.log(10000.0) / d_model))                       # (d_model//2,)
    t = jnp.arange(T, dtype=jnp.int32)
    col = t % d_model
    freq_row = div_term[col // 2]                                           # (T,)
    phase_row = (col % 2).astype(jnp.float32) * jnp.float32(math.pi / 2.0)  # (T,)
    pos_row = (t // d_model).astype(jnp.float32)                            # (T,)
    j = jnp.arange(row_tile, dtype=jnp.float32)[:, None] * jnp.float32(c)   # (row_tile,1)
    consts = jnp.stack([
        j + pos_row[None, :],                                               # position offset
        jnp.broadcast_to(freq_row[None, :], (row_tile, T)),                 # frequency
        jnp.broadcast_to(phase_row[None, :], (row_tile, T)),                # 0 / pi/2
    ], axis=0)                                                              # (3, row_tile, T)

    kernel = functools.partial(_pe_kernel, pos_per_block=P)

    n_s = G // row_tile
    n_b = B // batch_tile

    # Explicit scoped-VMEM sizing (v5e default of 16 MiB is too tight otherwise).
    out_block_bytes = batch_tile * row_tile * T * 4
    const_bytes = 3 * row_tile * T * 4
    scratch_bytes = row_tile * T * 4
    vmem_needed = 2 * out_block_bytes + 2 * const_bytes + scratch_bytes
    vmem_limit = int(min(max(vmem_needed + (4 << 20), 16 << 20), 48 << 20))

    cost = pl.CostEstimate(
        flops=3 * S * d_model,               # unique angle math (add, mul, add)
        transcendentals=S * d_model,         # one sin per unique PE element
        bytes_accessed=4 * (B * S * d_model + 3 * row_tile * T),
    )

    out3 = pl.pallas_call(
        kernel,
        out_shape=jax.ShapeDtypeStruct((B, G, T), jnp.float32),
        grid=(n_s, n_b),                     # seq outer ("parallel"), batch inner ("arbitrary")
        in_specs=[pl.BlockSpec((3, row_tile, T), lambda s, b: (0, 0, 0))],
        out_specs=pl.BlockSpec((batch_tile, row_tile, T), lambda s, b: (b, s, 0)),
        scratch_shapes=[pltpu.VMEM((row_tile, T), jnp.float32)],
        compiler_params=pltpu.CompilerParams(
            dimension_semantics=("parallel", "arbitrary"),
            vmem_limit_bytes=vmem_limit,
        ),
        cost_estimate=cost,
    )(consts)

    # Free, row-major reshape back to the module's output layout.
    return out3.reshape(B, S, d_model)


def _reference_pe(B, S, d_model):
    # Pure-JAX reference mirroring the PyTorch buffer construction.
    position = jnp.arange(S, dtype=jnp.float32)[:, None]
    div_term = jnp.exp(
        jnp.arange(0, d_model, 2, dtype=jnp.float32)
        * (-math.log(10000.0) / d_model))
    pe = jnp.zeros((S, d_model), dtype=jnp.float32)
    pe = pe.at[:, 0::2].set(jnp.sin(position * div_term))
    pe = pe.at[:, 1::2].set(jnp.cos(position * div_term))
    return jnp.broadcast_to(pe[None], (B, S, d_model))


if __name__ == "__main__":
    key = jax.random.PRNGKey(0)
    B, S, d_model = 2, 8, 32

    # data = {'x': x}; only x's (B, S) sizes matter for the forward pass.
    x = jax.random.normal(key, (B, S, d_model), dtype=jnp.float32)

    out = baseline_positional_encoding(x, d_model)
    out = jax.block_until_ready(out)

    ref = _reference_pe(B, S, d_model)
    assert out.shape == (B, S, d_model)
    assert jnp.allclose(out, ref, atol=2e-5, rtol=1e-5)

    print("KERNEL_OK")
</pallas_src>

<mosaic_0001>
module attributes {stable_mosaic.version = 11 : i64} {
  func.func @_pe_kernel(%arg0: i32, %arg1: i32, %arg2: memref<3x2x128xf32, #tpu.memory_space<vmem>>, %arg3: memref<2x2x128xf32, #tpu.memory_space<vmem>>, %arg4: memref<2x128xf32, #tpu.memory_space<vmem>>) attributes {dimension_semantics = [#tpu.dimension_semantics<parallel>, #tpu.dimension_semantics<arbitrary>], iteration_bounds = array<i64: 1, 1>, scalar_prefetch = 0 : i64, scratch_operands = 1 : i64, tpu.core_type = #tpu.core_type<tc>, window_params = [{pipeline_mode = #tpu.pipeline_mode<synchronous>, transform_indices = @transform_0, window_bounds = array<i64: 3, 2, 128>}, {transform_indices = @transform_1, window_bounds = array<i64: 2, 2, 128>}]} {
    %c0_i32 = arith.constant 0 : i32
    %0 = arith.cmpi eq, %arg1, %c0_i32 : i32
    %1 = arith.extui %0 : i1 to i32
    %c0_i32_0 = arith.constant 0 : i32
    %2 = arith.cmpi ne, %1, %c0_i32_0 : i32
    scf.if %2 {
      %c8_i32 = arith.constant 8 : i32
      %8 = arith.muli %arg0, %c8_i32 : i32
      %9 = arith.sitofp %8 : i32 to f32
      %c0_5 = arith.constant 0 : index
      %c0_6 = arith.constant 0 : index
      %c0_7 = arith.constant 0 : index
      %10 = vector.load %arg2[%c0_5, %c0_6, %c0_7] : memref<3x2x128xf32, #tpu.memory_space<vmem>>, vector<1x2x128xf32>
      %11 = vector.shape_cast %10 : vector<1x2x128xf32> to vector<2x128xf32>
      %12 = vector.broadcast %9 : f32 to vector<2x128xf32>
      %13 = arith.addf %12, %11 : vector<2x128xf32>
      %c1 = arith.constant 1 : index
      %c0_8 = arith.constant 0 : index
      %c0_9 = arith.constant 0 : index
      %14 = vector.load %arg2[%c1, %c0_8, %c0_9] : memref<3x2x128xf32, #tpu.memory_space<vmem>>, vector<1x2x128xf32>
      %15 = vector.shape_cast %14 : vector<1x2x128xf32> to vector<2x128xf32>
      %16 = arith.mulf %13, %15 : vector<2x128xf32>
      %c2 = arith.constant 2 : index
      %c0_10 = arith.constant 0 : index
      %c0_11 = arith.constant 0 : index
      %17 = vector.load %arg2[%c2, %c0_10, %c0_11] : memref<3x2x128xf32, #tpu.memory_space<vmem>>, vector<1x2x128xf32>
      %18 = vector.shape_cast %17 : vector<1x2x128xf32> to vector<2x128xf32>
      %19 = arith.addf %16, %18 : vector<2x128xf32>
      %20 = math.sin %19 : vector<2x128xf32>
      %c0_12 = arith.constant 0 : index
      %c0_13 = arith.constant 0 : index
      %21 = vector.load %arg4[%c0_12, %c0_13] : memref<2x128xf32, #tpu.memory_space<vmem>>, vector<2x128xf32>
      tpu.vector_store %arg4[%c0_12, %c0_13], %20 {strides = array<i32>} : memref<2x128xf32, #tpu.memory_space<vmem>>, vector<2x128xf32>,
    } else {
    }
    %c0 = arith.constant 0 : index
    %c0_1 = arith.constant 0 : index
    %3 = vector.load %arg4[%c0, %c0_1] : memref<2x128xf32, #tpu.memory_space<vmem>>, vector<2x128xf32>
    %4 = vector.shape_cast %3 : vector<2x128xf32> to vector<1x2x128xf32>
    %5 = vector.shape_cast %4 : vector<1x2x128xf32> to vector<1x2x128xf32>
    %6 = vector.broadcast %5 : vector<1x2x128xf32> to vector<2x2x128xf32>
    %c0_2 = arith.constant 0 : index
    %c0_3 = arith.constant 0 : index
    %c0_4 = arith.constant 0 : index
    %7 = vector.load %arg3[%c0_2, %c0_3, %c0_4] : memref<2x2x128xf32, #tpu.memory_space<vmem>>, vector<2x2x128xf32>
    tpu.vector_store %arg3[%c0_2, %c0_3, %c0_4], %6 {strides = array<i32>} : memref<2x2x128xf32, #tpu.memory_space<vmem>>, vector<2x2x128xf32>,
    return
  }
  func.func @transform_0(%arg0: i32, %arg1: i32) -> (i32, i32, i32) {
    %c0_i32 = arith.constant 0 : i32
    %c0_i32_0 = arith.constant 0 : i32
    %c0_i32_1 = arith.constant 0 : i32
    %c0_i32_2 = arith.constant 0 : i32
    return %c0_i32, %c0_i32_0, %c0_i32_1 : i32, i32, i32
  }
  func.func @transform_1(%arg0: i32, %arg1: i32) -> (i32, i32, i32) {
    %c0_i32 = arith.constant 0 : i32
    %c0_i32_0 = arith.constant 0 : i32
    return %arg1, %arg0, %c0_i32 : i32, i32, i32
  }
}

</mosaic_0001>

<bundles_post_ra>
// kernel: tpu_custom_call.1
= control target key start
LH: loop header
LB: loop body
LE: loop exit
PB: predicated region body
PF: predicated region fallthrough
CT: control target
= control target key end

     0   :  { %6 = vsyncpa [#allocation4], 0  ;;  %s304_s0 = inlined_call_operand.hbm [shape: f32[3,2,128], index: 0, kind: input, shape index: {}]   ;;  %s305_s1 = inlined_call_operand.hbm [shape: f32[2,2,128], index: 1, kind: output, shape index: {}]  }
   0x1   :  { %7 = vsyncpa [#allocation5], 0  ;;  %s233_s6 = smov [#allocation3]   ;;  %s185_s10 = scalar_lea.hbm %s304_s0, 96 }
   0x2   :  { %s13_s7 = sshll.u32 %s233_s6, 4  ;;  %p186_p0 = scmp.ne.s32.totalorder %s304_s0, %s185_s10  ;;  %s14_s7 = int_to_ptr.vmem [resolvable:$true] %s13_s7 }
   0x3   :  { %p189_p1 = scmp.lt.u32.totalorder %s185_s10, %s304_s0 }
   0x5   :  { %p191_p2 = pnand %p189_p1, %p186_p0 }
   0x7   :  { %194 = shalt.err (!%p191_p2)
}
   0x8   :  { %s195_s15 = scalar_lea.vmem %s14_s7, 96  ;;  %p200_p4 = scmp.lt.s32.totalorder %s14_s7, %s14_s7 }
   0x9   :  { %p196_p3 = scmp.ne.s32.totalorder %s14_s7, %s195_s15  ;;  %p201_p5 = scmp.lt.s32.totalorder %s195_s15, %s195_s15 }
   0xb   :  { %p202_p6 = por %p201_p5, %p200_p4 }
   0xd   :  { %p203_p7 = pnand %p202_p6, %p196_p3 }
   0xf   :  { %206 = shalt.err (!%p203_p7)
}
  0x10   :  { %s234_s16 = smov 32   ;;  %s235_s17 = smov 2  }
  0x11   :  { %19 = dma.hbm_to_vmem [thread:$0]  %s304_s0, 96, %s14_s7, [#allocation4], %s234_s16, %s234_s16, %s235_s17  }
  0x12   :  { %229 = dma.done.wait [#allocation4], 96  }
  0x13   :  { %230 = vsyncadd [#allocation4], 4294967200  ;;  %v29_v0 = vld [vmem:[#allocation3] sm:$0x3]  ;;  %v33_v1 = vld [vmem:[#allocation3 + $0x2] sm:$0x3] }
  0x14   :  { %v36_v2 = vld [vmem:[#allocation3 + $0x4] sm:$0x3]  ;;  %v34_v3 = vmul.f32 %v33_v1, %v29_v0  ;;  %v236_v16 = vmov 683565275   ;;  %v237_v18 = vmov 2475754826  }
  0x15   :  { %v238_v20 = vmov 2131351028   ;;  %v239_v22 = vmov 2102212464   ;;  %v240_v24 = vmov 920167782  }
  0x16   :  { %v268_v4 = vadd.f32 %v36_v2, %v34_v3  ;;  %v241_v31 = vmov 1326507024   ;;  %s242_s0 = smov [#allocation6]  }
  0x17   :  { %s151_s20 = sshll.u32 %s242_s0, 4  ;;  %s152_s20 = int_to_ptr.vmem [resolvable:$true] %s151_s20 }
  0x18   :  { %v41_v5 = vand.u32 2139095040, %v268_v4  ;;  %v38_v7 = vand.u32 2147483647, %v268_v4  ;;  %vm40_vm7 = vcmp.lt.s32.totalorder %v268_v4, 0  ;;  %vm130_vm12 = vweird.f32 %v268_v4  ;;  %s207_s21 = scalar_lea.vmem %s152_s20, 64  ;;  %p212_p9 = scmp.lt.s32.totalorder %s152_s20, %s152_s20 }
  0x19   :  { %p208_p8 = scmp.ne.s32.totalorder %s152_s20, %s207_s21  ;;  %p213_p10 = scmp.lt.s32.totalorder %s207_s21, %s207_s21 }
  0x1a   :  { %v42_v6 = vshrl.u32 %v41_v5, 23  ;;  %v45_v10 = vand.u32 8388607, %v38_v7  ;;  %vm39_vm8 = vcmp.le.f32.partialorder %v38_v7, 0.7853982 }
  0x1b   :  { %p214_p11 = por %p213_p10, %p212_p9 }
  0x1c   :  { %v163_v8 = vadd.s32 4294967169, %v42_v6  ;;  %v46_v13 = vor.u32 8388608, %v45_v10 }
  0x1d   :  { %p215_p12 = pnand %p214_p11, %p208_p8 }
  0x1e   :  { %v48_v9 = vadd.s32 1, %v163_v8  ;;  %v86_v33 = vshll.u32 %v46_v13, 8 }
  0x20   :  { %vm49_vm0 = vcmp.gt.s32.totalorder %v48_v9, 0 }
  0x21   :  { %v50_v11 = vsel %vm49_vm0, %v48_v9, 0 }
  0x22   :  { %v52_v12 = vand.u32 31, %v50_v11  ;;  %v51_v14 = vshrl.u32 %v50_v11, 5 }
  0x24   :  { %v53_v15 = vsub.s32 32, %v52_v12  ;;  %v55_v17 = vshll.u32 %v236_v16, %v52_v12  ;;  %v58_v19 = vshll.u32 %v237_v18, %v52_v12  ;;  %v61_v21 = vshll.u32 %v238_v20, %v52_v12 }
  0x25   :  { %v64_v23 = vshll.u32 %v239_v22, %v52_v12  ;;  %v67_v25 = vshll.u32 %v240_v24, %v52_v12  ;;  %vm70_vm1 = vcmp.lt.s32.totalorder %v51_v14, 1  ;;  %vm73_vm2 = vcmp.lt.s32.totalorder %v51_v14, 4 }
  0x26   :  { %v54_v26 = vshrl.u32 %v236_v16, %v53_v15  ;;  %v56_v27 = vshrl.u32 %v237_v18, %v53_v15  ;;  %v59_v28 = vshrl.u32 %v238_v20, %v53_v15  ;;  %v62_v29 = vshrl.u32 %v239_v22, %v53_v15 }
  0x27   :  { %v65_v30 = vshrl.u32 %v240_v24, %v53_v15  ;;  %v68_v32 = vshrl.u32 %v241_v31, %v53_v15  ;;  %vm71_vm3 = vcmp.lt.s32.totalorder %v51_v14, 2  ;;  %vm72_vm4 = vcmp.lt.s32.totalorder %v51_v14, 3 }
  0x28   :  { %v57_v34 = vor.u32 %v56_v27, %v55_v17  ;;  %v60_v35 = vor.u32 %v59_v28, %v58_v19  ;;  %v63_v36 = vor.u32 %v62_v29, %v61_v21 }
  0x29   :  { %v66_v37 = vor.u32 %v65_v30, %v64_v23  ;;  %v69_v38 = vor.u32 %v68_v32, %v67_v25 }
  0x2a   :  { %v74_v39 = vsel %vm70_vm1, %v54_v26, %v57_v34  ;;  %v75_v40 = vsel %vm73_vm2, %v63_v36, 2102212464  ;;  %v78_v41 = vsel %vm70_vm1, %v57_v34, %v60_v35  ;;  %v82_v42 = vsel %vm70_vm1, %v60_v35, %v63_v36 }
  0x2b   :  { %v76_v43 = vsel %vm72_vm4, %v60_v35, %v75_v40  ;;  %v79_v44 = vsel %vm73_vm2, %v66_v37, 920167782  ;;  %v83_v45 = vsel %vm73_vm2, %v69_v38, 1326507024 }
  0x2c   :  { %v80_v46 = vsel %vm72_vm4, %v63_v36, %v79_v44  ;;  %v84_v47 = vsel %vm72_vm4, %v66_v37, %v83_v45  ;;  %v77_v48 = vsel %vm71_vm3, %v74_v39, %v76_v43 }
  0x2d   :  { %v81_v49 = vsel %vm71_vm3, %v78_v41, %v80_v46  ;;  %v85_v50 = vsel %vm71_vm3, %v82_v42, %v84_v47  ;;  %v93_v55 = vmul.u32 %v86_v33, %v77_v48 }
  0x2e   :  { %v274_v51 = vmul.u32.u64.low %v86_v33, %v85_v50  ;;  %v275_v52 = vmul.u32.u64.high %v86_v33, %v85_v50, %v274_v51  ;;  %v277_v53 = vmul.u32.u64.low %v86_v33, %v81_v49  ;;  %v278_v54 = vmul.u32.u64.high %v86_v33, %v81_v49, %v277_v53 }
  0x30   :  { %vm95_vm5 = vc.u32 %v275_v52, %v277_v53  ;;  %v96_v56 = vadd.s32 1, %v278_v54  ;;  %v94_v3 = vadd.s32 %v277_v53, %v275_v52 }
  0x32   :  { %v97_v57 = vsel %vm95_vm5, %v96_v56, %v278_v54 }
  0x33   :  { %v98_v58 = vadd.s32 %v97_v57, %v93_v55 }
  0x35   :  { %v99_v59 = vadd.s32 536870912, %v98_v58 }
  0x37   :  { %v100_v60 = vshrl.u32 %v99_v59, 30 }
  0x39   :  { %v101_v61 = vshll.u32 %v100_v60, 30  ;;  %v124_v17 = vsub.s32 4, %v100_v60 }
  0x3b   :  { %v102_v62 = vsub.s32 %v98_v58, %v101_v61  ;;  %v125_v20 = vsel %vm40_vm7, %v124_v17, %v100_v60 }
  0x3c   :  { %v127_v23 = vsel %vm39_vm8, 0, %v125_v20 }
  0x3d   :  { %v104_v63 = vsub.s32 0, %v102_v62  ;;  %v131_v24 = vadd.s32 3, %v127_v23 }
  0x3f   :  { %v164_v0 = vmin.u32 %v104_v63, %v102_v62  ;;  %v132_v25 = vand.u32 3, %v131_v24 }
  0x41   :  { %v106_v1 = vclz %v164_v0  ;;  %vm137_vm9 = vcmp.eq.s32.totalorder %v132_v25, 2  ;;  %vm134_vm10 = vcmp.eq.s32.totalorder %v132_v25, 0  ;;  %vm133_vm11 = vcmp.lt.s32.totalorder %v132_v25, 2 }
  0x43   :  { %v165_v2 = vadd.s32 4294967294, %v106_v1 }
  0x45   :  { %vm166_vm6 = vcmp.lt.s32.totalorder %v165_v2, 0 }
  0x46   :  { %v109_v5 = vsel %vm166_vm6, 0, %v165_v2 }
  0x47   :  { %v110_v6 = vsub.s32 32, %v109_v5  ;;  %v111_v8 = vshll.u32 %v102_v62, %v109_v5  ;;  %v114_v9 = vsub.s32 4294967266, %v109_v5 }
  0x49   :  { %v112_v10 = vshrl.u32 %v94_v3, %v110_v6  ;;  %v115_v11 = vadd.s32 127, %v114_v9 }
  0x4b   :  { %v113_v12 = vor.u32 %v112_v10, %v111_v8  ;;  %v116_v13 = vshll.u32 %v115_v11, 23 }
  0x4d   :  { %v117_v14 = vor.u32 4788187, %v116_v13  ;;  %v120_v15 = vcvt.s32.f32 %v113_v12 }
  0x4f   :  { %v118_v16 = vand.u32 2147483647, %v117_v14 }
  0x51   :  { %v121_v18 = vmul.f32 %v120_v15, %v118_v16 }
  0x53   :  { %v122_v19 = vxor.u32 2147483648, %v121_v18 }
  0x55   :  { %v123_v21 = vsel %vm40_vm7, %v122_v19, %v121_v18 }
  0x56   :  { %v126_v22 = vsel %vm39_vm8, %v268_v4, %v123_v21 }
  0x57   :  { %181 = vcosq.f32 %v126_v22 }
  0x58   :  { %183 = vsinq.f32 %v126_v22 }
  0x61   :  { %v182_v26 = vpop.eup %181 }
  0x62   :  { %v184_v27 = vpop.eup %183  ;;  %v138_v28 = vxor.u32 2147483648, %v182_v26 }
  0x63   :  { %v135_v29 = vxor.u32 2147483648, %v184_v27 }
  0x64   :  { %v139_v7 = vsel %vm137_vm9, %v138_v28, %v184_v27 }
  0x65   :  { %v136_v30 = vsel %vm134_vm10, %v182_v26, %v135_v29 }
  0x66   :  { %v140_v31 = vsel %vm133_vm11, %v136_v30, %v139_v7 }
  0x67   :  { %v141_v32 = vsel %vm130_vm12, nan, %v140_v31 }
  0x68   :  { %142 = vst [vmem:[#allocation2] sm:$0x3] %v141_v32 }
  0x6f   :  { %v143_v33 = vld [vmem:[#allocation2] sm:$0x3] }
  0x70   :  { %144 = vst [vmem:[#allocation6] sm:$0x3] %v143_v33  ;;  %145 = vst [vmem:[#allocation6 + $0x2] sm:$0x3] %v143_v33 }
  0x71   :  { %218 = shalt.err (!%p215_p12)
}
  0x72   :  { %s219_s24 = scalar_lea.hbm %s305_s1, 64 }
  0x73   :  { %p220_p13 = scmp.ne.s32.totalorder %s305_s1, %s219_s24  ;;  %p223_p0 = scmp.lt.u32.totalorder %s219_s24, %s305_s1 }
  0x75   :  { %p225_p1 = pnand %p223_p0, %p220_p13 }
  0x77   :  { %228 = shalt.err (!%p225_p1)
}
  0x78   :  { %157 = dma.vmem_to_hbm [thread:$0]  %s152_s20, 64, %s305_s1, [#allocation5], %s234_s16, %s234_s16, %s235_s17  }
  0x79   :  { %231 = dma.done.wait [#allocation5], 64  }
  0x7a   :  { %232 = vsyncadd [#allocation5], 4294967232 }
  0x7b   :  { %161 = vsyncpa [#allocation4], 1 }
  0x7c   :  { %162 = vsyncpa [#allocation5], 1 }

</bundles_post_ra>
